<compile_context>
chip_gen: v7x
topology: tpu7x:2x2x1
jax: 0.10.0
libtpu: 0.0.40
codegen_flags: <defaults>
</compile_context>

<pallas_src>
import functools

import jax
import jax.numpy as jnp
from jax.experimental import pallas as pl
from jax.experimental.pallas import tpu as pltpu

EPSILON = 0.1
L2O_VERSION = "ours"          # one of: 'ours', 'ugotnl', 'nrago'
NUM_INPUTS = 4                # synthetic self.inputs = ['x0','x1','x2','x3']
NUM_CONSTRAINTS = 4
MAX_CORE_SPLITS = 2           # leading 'parallel' grid axis (2 TCs on v7x)
MAX_BATCH_TILE = 65536        # lanes per block: 4 * 65536 * 4B = 1 MiB
LANE = 128


# ----------------------------------------------------------------------------
# L2O relaxations (trace-time version dispatch, mirroring the torch module)
# ----------------------------------------------------------------------------
def _l2o_eq(x, eps, version):
    if version == "ours":
        return jnp.maximum(jnp.abs(x) - eps, 0.0)
    elif version in ("ugotnl", "nrago"):
        return x * x
    raise ValueError(f"Unknown L2O version {version}")


def _l2o_leq(x, eps, version):
    if version == "ours":
        return jnp.maximum(x, 0.0)
    elif version == "ugotnl":
        return jnp.where(x <= 0, 0.0, x * x)
    elif version == "nrago":
        return x
    raise ValueError(f"Unknown L2O version {version}")


def _l2o_lt(x, eps, version):
    if version == "ours":
        return jnp.maximum(x, -eps)
    elif version == "ugotnl":
        return _l2o_leq(x, eps, "ugotnl")
    elif version == "nrago":
        return x
    raise ValueError(f"Unknown L2O version {version}")


# ----------------------------------------------------------------------------
# Pallas kernel: lane-dense constraint eval + resident-accumulator AND-reduce
# ----------------------------------------------------------------------------
def _attack_kernel(x_ref, o_ref, acc_ref, *, epsilon, l2o_version,
                   actual_b, tb, steps_per_core, apply_mask):
    c = pl.program_id(0)          # 'parallel' core-split axis
    i = pl.program_id(1)          # 'arbitrary' batch-reduction axis

    @pl.when(i == 0)
    def _():
        acc_ref[...] = jnp.zeros_like(acc_ref)

    x = x_ref[...]                # (NUM_INPUTS, tb) — batch on lanes
    x0 = x[0:1, :]
    x1 = x[1:2, :]
    x2 = x[2:3, :]
    x3 = x[3:4, :]

    c0 = _l2o_eq(x0 + x1 - 1.0, epsilon, l2o_version)
    c1 = _l2o_leq(x2 - x3, epsilon, l2o_version)
    c2 = _l2o_lt(x0 * x2, epsilon, l2o_version)
    c3 = _l2o_eq(x1 * x3 - 0.5, epsilon, l2o_version)

    if l2o_version == "nrago":
        # _l2o_and clips the stacked constraints at 0 before summing.
        c0 = jnp.maximum(c0, 0.0)
        c1 = jnp.maximum(c1, 0.0)
        c2 = jnp.maximum(c2, 0.0)
        c3 = jnp.maximum(c3, 0.0)

    if apply_mask:
        # Mask out padded batch lanes of the (possibly ragged) last tile.
        lane = jax.lax.broadcasted_iota(jnp.int32, (1, tb), 1)
        start = (c * steps_per_core + i) * tb
        m = ((lane + start) < actual_b).astype(jnp.float32)
        c0 = c0 * m
        c1 = c1 * m
        c2 = c2 * m
        c3 = c3 * m

    # Lane-dense per-constraint accumulation (no lane-axis concatenate).
    acc_ref[0:1, :] = acc_ref[0:1, :] + c0
    acc_ref[1:2, :] = acc_ref[1:2, :] + c1
    acc_ref[2:3, :] = acc_ref[2:3, :] + c2
    acc_ref[3:4, :] = acc_ref[3:4, :] + c3

    @pl.when(i == pl.num_programs(1) - 1)
    def _():
        # Single lane reduce at the end: (NUM_CONSTRAINTS, tb) -> (C, 1)
        o_ref[0] = jnp.sum(acc_ref[...], axis=1, keepdims=True)


def _choose_splits_and_tile(batch, batch_tile):
    """Pick (num_core_splits, lane-aligned batch tile)."""
    # Only split across cores when each core gets at least one full 128-lane
    # tile; otherwise the split only adds padding + grid overhead.
    splits = MAX_CORE_SPLITS if batch >= MAX_CORE_SPLITS * LANE else 1
    if batch_tile is not None:
        tb = max(LANE, pl.cdiv(batch_tile, LANE) * LANE)
    else:
        per_core = pl.cdiv(batch, splits)
        tb = max(LANE, pl.cdiv(per_core, LANE) * LANE)   # lane-aligned
        tb = min(tb, MAX_BATCH_TILE)
    return splits, tb


def general_attack_forward(x, epsilon=EPSILON, l2o_version=L2O_VERSION,
                           batch_tile=None):
    """x: (batch, NUM_INPUTS) -> (NUM_CONSTRAINTS,) float32."""
    b, n = x.shape
    assert n == NUM_INPUTS
    x = x.astype(jnp.float32)

    splits, tb = _choose_splits_and_tile(b, batch_tile)
    chunk = splits * tb
    padded_b = pl.cdiv(b, chunk) * chunk
    steps_per_core = padded_b // chunk

    # Lane-dense layout: batch on the 128-lane axis, the 4 inputs on sublanes.
    xt = x.T                                     # (NUM_INPUTS, b)
    if padded_b != b:
        xt = jnp.pad(xt, ((0, 0), (0, padded_b - b)))

    kernel = functools.partial(
        _attack_kernel,
        epsilon=epsilon,
        l2o_version=l2o_version,
        actual_b=b,
        tb=tb,
        steps_per_core=steps_per_core,
        apply_mask=(padded_b != b),
    )

    out = pl.pallas_call(
        kernel,
        out_shape=jax.ShapeDtypeStruct(
            (splits, NUM_CONSTRAINTS, 1), jnp.float32),
        grid=(splits, steps_per_core),
        in_specs=[pl.BlockSpec(
            (NUM_INPUTS, tb),
            lambda c, i: (0, c * steps_per_core + i))],
        out_specs=pl.BlockSpec(
            (1, NUM_CONSTRAINTS, 1), lambda c, i: (c, 0, 0)),
        scratch_shapes=[pltpu.VMEM((NUM_CONSTRAINTS, tb), jnp.float32)],
        compiler_params=pltpu.CompilerParams(
            dimension_semantics=("parallel", "arbitrary")),
    )(xt)

    # Per-core partial sums -> final (NUM_CONSTRAINTS,)
    return jnp.sum(out[:, :, 0], axis=0)


# ----------------------------------------------------------------------------
# Pure-JAX reference (mirrors the torch code path) for correctness checking
# ----------------------------------------------------------------------------
def _reference_forward(x, epsilon=EPSILON, l2o_version=L2O_VERSION):
    x = x.astype(jnp.float32)
    x0, x1, x2, x3 = x[:, 0], x[:, 1], x[:, 2], x[:, 3]
    c0 = _l2o_eq(x0 + x1 - 1.0, epsilon, l2o_version)
    c1 = _l2o_leq(x2 - x3, epsilon, l2o_version)
    c2 = _l2o_lt(x0 * x2, epsilon, l2o_version)
    c3 = _l2o_eq(x1 * x3 - 0.5, epsilon, l2o_version)
    stacked = jnp.stack([c0, c1, c2, c3])              # (C, B)
    if l2o_version == "nrago":
        stacked = jnp.maximum(stacked, 0.0)
    return jnp.sum(stacked, axis=1)                     # (C,)


if __name__ == "__main__":
    # TODO(synk): the original __init__ parses SMT-LIB files / scripts
    # (traverse_summands_of_mbo, utils._extract_input, utils.get_variables);
    # that host-side string parsing is replaced here by a fixed synthetic
    # 4-input formula.
    key = jax.random.PRNGKey(0)
    batch = 8
    x = jax.random.normal(key, (batch, NUM_INPUTS), dtype=jnp.float32)

    out = jax.block_until_ready(general_attack_forward(x))
    ref = _reference_forward(x)
    assert out.shape == (NUM_CONSTRAINTS,)
    assert jnp.allclose(out, ref, atol=1e-5, rtol=1e-5), (out, ref)

    # Exercise the multi-step accumulator path, the 2-way core split and the
    # ragged-tail masking.
    x2 = jax.random.normal(jax.random.PRNGKey(1), (300, NUM_INPUTS),
                           dtype=jnp.float32)
    out2 = jax.block_until_ready(general_attack_forward(x2, batch_tile=128))
    ref2 = _reference_forward(x2)
    assert jnp.allclose(out2, ref2, atol=1e-3, rtol=1e-4), (out2, ref2)

    # Exercise the alternate L2O relaxations as well.
    for version in ("ugotnl", "nrago"):
        out3 = jax.block_until_ready(
            general_attack_forward(x2, l2o_version=version, batch_tile=128))
        ref3 = _reference_forward(x2, l2o_version=version)
        assert jnp.allclose(out3, ref3, atol=1e-3, rtol=1e-4), (version, out3, ref3)

    print("KERNEL_OK")
</pallas_src>

<mosaic_0001>
module attributes {stable_mosaic.version = 11 : i64} {
  func.func @_attack_kernel(%arg0: i32, %arg1: i32, %arg2: memref<4x128xf32, #tpu.memory_space<vmem>>, %arg3: memref<1x4x1xf32, #tpu.memory_space<vmem>>, %arg4: memref<4x128xf32, #tpu.memory_space<vmem>>) attributes {dimension_semantics = [#tpu.dimension_semantics<parallel>, #tpu.dimension_semantics<arbitrary>], iteration_bounds = array<i64: 1, 1>, scalar_prefetch = 0 : i64, scratch_operands = 1 : i64, tpu.core_type = #tpu.core_type<tc>, window_params = [{transform_indices = @transform_0, window_bounds = array<i64: 4, 128>}, {transform_indices = @transform_1, window_bounds = array<i64: 1, 4, 1>}]} {
    %c0_i32 = arith.constant 0 : i32
    %0 = arith.cmpi eq, %arg1, %c0_i32 : i32
    %1 = arith.extui %0 : i1 to i32
    %c0_i32_0 = arith.constant 0 : i32
    %2 = arith.cmpi ne, %1, %c0_i32_0 : i32
    scf.if %2 {
      %cst_24 = arith.constant 0.000000e+00 : f32
      %59 = vector.broadcast %cst_24 : f32 to vector<4x128xf32>
      %c0_25 = arith.constant 0 : index
      %c0_26 = arith.constant 0 : index
      %60 = vector.load %arg4[%c0_25, %c0_26] : memref<4x128xf32, #tpu.memory_space<vmem>>, vector<4x128xf32>
      tpu.vector_store %arg4[%c0_25, %c0_26], %59 {strides = array<i32>} : memref<4x128xf32, #tpu.memory_space<vmem>>, vector<4x128xf32>,
    } else {
    }
    %c0 = arith.constant 0 : index
    %c0_1 = arith.constant 0 : index
    %3 = vector.load %arg2[%c0, %c0_1] : memref<4x128xf32, #tpu.memory_space<vmem>>, vector<4x128xf32>
    %4 = vector.extract_strided_slice %3 {offsets = [0, 0], sizes = [1, 128], strides = [1, 1]} : vector<4x128xf32> to vector<1x128xf32>
    %5 = vector.extract_strided_slice %3 {offsets = [1, 0], sizes = [1, 128], strides = [1, 1]} : vector<4x128xf32> to vector<1x128xf32>
    %6 = vector.extract_strided_slice %3 {offsets = [2, 0], sizes = [1, 128], strides = [1, 1]} : vector<4x128xf32> to vector<1x128xf32>
    %7 = vector.extract_strided_slice %3 {offsets = [3, 0], sizes = [1, 128], strides = [1, 1]} : vector<4x128xf32> to vector<1x128xf32>
    %8 = arith.addf %4, %5 : vector<1x128xf32>
    %cst = arith.constant 1.000000e+00 : f32
    %9 = vector.broadcast %cst : f32 to vector<1x128xf32>
    %10 = arith.subf %8, %9 : vector<1x128xf32>
    %11 = math.absf %10 : vector<1x128xf32>
    %cst_2 = arith.constant 1.000000e-01 : f32
    %12 = vector.broadcast %cst_2 : f32 to vector<1x128xf32>
    %13 = arith.subf %11, %12 : vector<1x128xf32>
    %cst_3 = arith.constant 0.000000e+00 : f32
    %14 = vector.broadcast %cst_3 : f32 to vector<1x128xf32>
    %15 = arith.maximumf %13, %14 : vector<1x128xf32>
    %16 = arith.subf %6, %7 : vector<1x128xf32>
    %cst_4 = arith.constant 0.000000e+00 : f32
    %17 = vector.broadcast %cst_4 : f32 to vector<1x128xf32>
    %18 = arith.maximumf %16, %17 : vector<1x128xf32>
    %19 = arith.mulf %4, %6 : vector<1x128xf32>
    %cst_5 = arith.constant -1.000000e-01 : f32
    %20 = vector.broadcast %cst_5 : f32 to vector<1x128xf32>
    %21 = arith.maximumf %19, %20 : vector<1x128xf32>
    %22 = arith.mulf %5, %7 : vector<1x128xf32>
    %cst_6 = arith.constant 5.000000e-01 : f32
    %23 = vector.broadcast %cst_6 : f32 to vector<1x128xf32>
    %24 = arith.subf %22, %23 : vector<1x128xf32>
    %25 = math.absf %24 : vector<1x128xf32>
    %cst_7 = arith.constant 1.000000e-01 : f32
    %26 = vector.broadcast %cst_7 : f32 to vector<1x128xf32>
    %27 = arith.subf %25, %26 : vector<1x128xf32>
    %cst_8 = arith.constant 0.000000e+00 : f32
    %28 = vector.broadcast %cst_8 : f32 to vector<1x128xf32>
    %29 = arith.maximumf %27, %28 : vector<1x128xf32>
    %30 = tpu.iota {dimensions = array<i32: 1>} : vector<1x128xi32>
    %c1_i32 = arith.constant 1 : i32
    %31 = arith.muli %arg0, %c1_i32 : i32
    %32 = arith.addi %31, %arg1 : i32
    %c128_i32 = arith.constant 128 : i32
    %33 = arith.muli %32, %c128_i32 : i32
    %34 = vector.broadcast %33 : i32 to vector<1x128xi32>
    %35 = arith.addi %30, %34 : vector<1x128xi32>
    %c8_i32 = arith.constant 8 : i32
    %36 = vector.broadcast %c8_i32 : i32 to vector<1x128xi32>
    %37 = arith.cmpi slt, %35, %36 : vector<1x128xi32>
    %38 = arith.extui %37 : vector<1x128xi1> to vector<1x128xi32>
    %39 = arith.sitofp %38 : vector<1x128xi32> to vector<1x128xf32>
    %40 = arith.mulf %15, %39 : vector<1x128xf32>
    %41 = arith.mulf %18, %39 : vector<1x128xf32>
    %42 = arith.mulf %21, %39 : vector<1x128xf32>
    %43 = arith.mulf %29, %39 : vector<1x128xf32>
    %c0_9 = arith.constant 0 : index
    %c0_10 = arith.constant 0 : index
    %44 = vector.load %arg4[%c0_9, %c0_10] : memref<4x128xf32, #tpu.memory_space<vmem>>, vector<1x128xf32>
    %45 = arith.addf %44, %40 : vector<1x128xf32>
    %c0_11 = arith.constant 0 : index
    %c0_12 = arith.constant 0 : index
    %46 = vector.load %arg4[%c0_11, %c0_12] : memref<4x128xf32, #tpu.memory_space<vmem>>, vector<1x128xf32>
    tpu.vector_store %arg4[%c0_11, %c0_12], %45 {strides = array<i32>} : memref<4x128xf32, #tpu.memory_space<vmem>>, vector<1x128xf32>,
    %c1 = arith.constant 1 : index
    %c0_13 = arith.constant 0 : index
    %47 = vector.load %arg4[%c1, %c0_13] : memref<4x128xf32, #tpu.memory_space<vmem>>, vector<1x128xf32>
    %48 = arith.addf %47, %41 : vector<1x128xf32>
    %c1_14 = arith.constant 1 : index
    %c0_15 = arith.constant 0 : index
    %49 = vector.load %arg4[%c1_14, %c0_15] : memref<4x128xf32, #tpu.memory_space<vmem>>, vector<1x128xf32>
    tpu.vector_store %arg4[%c1_14, %c0_15], %48 {strides = array<i32>} : memref<4x128xf32, #tpu.memory_space<vmem>>, vector<1x128xf32>,
    %c2 = arith.constant 2 : index
    %c0_16 = arith.constant 0 : index
    %50 = vector.load %arg4[%c2, %c0_16] : memref<4x128xf32, #tpu.memory_space<vmem>>, vector<1x128xf32>
    %51 = arith.addf %50, %42 : vector<1x128xf32>
    %c2_17 = arith.constant 2 : index
    %c0_18 = arith.constant 0 : index
    %52 = vector.load %arg4[%c2_17, %c0_18] : memref<4x128xf32, #tpu.memory_space<vmem>>, vector<1x128xf32>
    tpu.vector_store %arg4[%c2_17, %c0_18], %51 {strides = array<i32>} : memref<4x128xf32, #tpu.memory_space<vmem>>, vector<1x128xf32>,
    %c3 = arith.constant 3 : index
    %c0_19 = arith.constant 0 : index
    %53 = vector.load %arg4[%c3, %c0_19] : memref<4x128xf32, #tpu.memory_space<vmem>>, vector<1x128xf32>
    %54 = arith.addf %53, %43 : vector<1x128xf32>
    %c3_20 = arith.constant 3 : index
    %c0_21 = arith.constant 0 : index
    %55 = vector.load %arg4[%c3_20, %c0_21] : memref<4x128xf32, #tpu.memory_space<vmem>>, vector<1x128xf32>
    tpu.vector_store %arg4[%c3_20, %c0_21], %54 {strides = array<i32>} : memref<4x128xf32, #tpu.memory_space<vmem>>, vector<1x128xf32>,
    %c0_i32_22 = arith.constant 0 : i32
    %56 = arith.cmpi eq, %arg1, %c0_i32_22 : i32
    %57 = arith.extui %56 : i1 to i32
    %c0_i32_23 = arith.constant 0 : i32
    %58 = arith.cmpi ne, %57, %c0_i32_23 : i32
    scf.if %58 {
      %c0_24 = arith.constant 0 : index
      %c0_25 = arith.constant 0 : index
      %59 = vector.load %arg4[%c0_24, %c0_25] : memref<4x128xf32, #tpu.memory_space<vmem>>, vector<4x128xf32>
      %cst_26 = arith.constant dense<0.000000e+00> : vector<4xf32>
      %60 = vector.multi_reduction <add>, %59, %cst_26 [1] : vector<4x128xf32> to vector<4xf32>
      %61 = vector.shape_cast %60 : vector<4xf32> to vector<4x1xf32>
      %c0_27 = arith.constant 0 : index
      %c0_28 = arith.constant 0 : index
      %c0_29 = arith.constant 0 : index
      %62 = vector.load %arg3[%c0_27, %c0_28, %c0_29] : memref<1x4x1xf32, #tpu.memory_space<vmem>>, vector<1x4x1xf32>
      %63 = vector.shape_cast %62 : vector<1x4x1xf32> to vector<4x1xf32>
      %64 = vector.shape_cast %61 : vector<4x1xf32> to vector<1x4x1xf32>
      tpu.vector_store %arg3[%c0_27, %c0_28, %c0_29], %64 {strides = array<i32>} : memref<1x4x1xf32, #tpu.memory_space<vmem>>, vector<1x4x1xf32>,
    } else {
    }
    return
  }
  func.func @transform_0(%arg0: i32, %arg1: i32) -> (i32, i32) {
    %c1_i32 = arith.constant 1 : i32
    %0 = arith.muli %arg0, %c1_i32 : i32
    %1 = arith.addi %0, %arg1 : i32
    %c0_i32 = arith.constant 0 : i32
    %c0_i32_0 = arith.constant 0 : i32
    return %c0_i32, %1 : i32, i32
  }
  func.func @transform_1(%arg0: i32, %arg1: i32) -> (i32, i32, i32) {
    %c0_i32 = arith.constant 0 : i32
    %c0_i32_0 = arith.constant 0 : i32
    %c0_i32_1 = arith.constant 0 : i32
    return %arg0, %c0_i32, %c0_i32_0 : i32, i32, i32
  }
}

</mosaic_0001>

<bundles_post_ra>
// kernel: tpu_custom_call.1
= control target key start
LH: loop header
LB: loop body
LE: loop exit
PB: predicated region body
PF: predicated region fallthrough
CT: control target
= control target key end

     0   :  { %6 = vsyncpa [#allocation4], 0  ;;  %s125_s6 = smov [#allocation3]   ;;  %s152_s0 = inlined_call_operand.hbm [shape: f32[4,128], index: 0, kind: input, shape index: {}]   ;;  %s153_s1 = inlined_call_operand.vmem [shape: f32[1,4,1], index: 1, kind: output, shape index: {}]  }
   0x1   :  { %s16_s7 = sshll.u32 %s125_s6, 4  ;;  %s101_s10 = scalar_lea.hbm %s152_s0, 64  ;;  %s17_s7 = int_to_ptr.vmem [resolvable:$true] %s16_s7 }
   0x2   :  { %p102_p0 = scmp.ne.s32.totalorder %s152_s0, %s101_s10  ;;  %p105_p1 = scmp.lt.u32.totalorder %s101_s10, %s152_s0 }
   0x4   :  { %p107_p2 = pnand %p105_p1, %p102_p0 }
   0x6   :  { %110 = shalt.err (!%p107_p2)
}
   0x7   :  { %s111_s15 = scalar_lea.vmem %s17_s7, 64  ;;  %p116_p4 = scmp.lt.s32.totalorder %s17_s7, %s17_s7 }
   0x8   :  { %p112_p3 = scmp.ne.s32.totalorder %s17_s7, %s111_s15  ;;  %p117_p5 = scmp.lt.s32.totalorder %s111_s15, %s111_s15 }
   0xa   :  { %p118_p6 = por %p117_p5, %p116_p4 }
   0xc   :  { %p119_p7 = pnand %p118_p6, %p112_p3 }
   0xe   :  { %122 = shalt.err (!%p119_p7)
}
   0xf   :  { %19 = dma.hbm_to_vmem [thread:$0]  %s152_s0, 64, %s17_s7, [#allocation4]  }
  0x10   :  { %123 = dma.done.wait [#allocation4], 64  }
  0x11   :  { %124 = vsyncadd [#allocation4], 4294967232  ;;  %v48_v0 = vlaneseq  ;;  %v126_v1 = vmov 0.0   ;;  %v29_v3 = vld [vmem:[#allocation3] sm:$0xf]  ;;  %vm83_vm1 = vcmask 1043456  }
  0x12   :  { %28 = vst [vmem:[#allocation2] sm:$0xf] %v126_v1  ;;  %v31_v4 = vrot.slane %v29_v3, 1  ;;  %v40_v5 = vrot.slane %v29_v3, 2  ;;  %vm87_vm2 = vcmask 3072  }
  0x13   :  { %v49_v2 = vand.u32 127, %v48_v0 }
  0x14   :  { %v33_v6 = vadd.f32 %v31_v4, %v29_v3  ;;  %v38_v7 = vsub.f32 %v29_v3, %v31_v4  ;;  %v42_v8 = vmul.f32 %v40_v5, %v29_v3 }
  0x15   :  { %vm54_vm0 = vcmp.lt.s32.totalorder %v49_v2, 8 }
  0x16   :  { %v98_v9 = vsel %vm54_vm0, 1.0, %v126_v1  ;;  %v94_v10 = vadd.f32 -1.0, %v33_v6  ;;  %v39_v11 = vmax.f32 %v38_v7, 0.0  ;;  %v43_v12 = vmax.f32 %v42_v8, -0.1 }
  0x17   :  { %v96_v13 = vadd.f32 -0.5, %v42_v8 }
  0x18   :  { %v35_v15 = vand.u32 2147483647, %v94_v10  ;;  %v58_v17 = vmul.f32 %v98_v9, %v39_v11  ;;  %v59_v18 = vmul.f32 %v98_v9, %v43_v12 }
  0x19   :  { %v70_v14 = vld [vmem:[#allocation2 + $0x2] sm:$0x1]  ;;  %v45_v16 = vand.u32 2147483647, %v96_v13  ;;  %v64_v19 = vld [vmem:[#allocation2 + $0x1] sm:$0x1] }
  0x1a   :  { %v95_v20 = vadd.f32 -0.1, %v35_v15  ;;  %v66_v22 = vrot.slane %v58_v17, 2  ;;  %v71_v23 = vadd.f32 %v70_v14, %v59_v18  ;;  %v61_v27 = vld [vmem:[#allocation2] sm:$0x1] }
  0x1b   :  { %v97_v21 = vadd.f32 -0.1, %v45_v16  ;;  %v73_v30 = vld [vmem:[#allocation2 + $0x3] sm:$0x1] }
  0x1c   :  { %v37_v24 = vmax.f32 %v95_v20, 0.0  ;;  %v68_v26 = vadd.f32 %v66_v22, %v64_v19  ;;  %72 = vst [vmem:[#allocation2 + $0x2] sm:$0x1] %v71_v23 }
  0x1d   :  { %v47_v25 = vmax.f32 %v97_v21, 0.0 }
  0x1e   :  { %v57_v28 = vmul.f32 %v98_v9, %v37_v24  ;;  %69 = vst [vmem:[#allocation2 + $0x1] sm:$0x1] %v68_v26 }
  0x1f   :  { %v60_v29 = vmul.f32 %v98_v9, %v47_v25 }
  0x20   :  { %v62_v31 = vadd.f32 %v61_v27, %v57_v28 }
  0x21   :  { %v75_v32 = vrot.slane %v60_v29, 1 }
  0x22   :  { %63 = vst [vmem:[#allocation2] sm:$0x1] %v62_v31 }
  0x23   :  { %v77_v33 = vadd.f32 %v75_v32, %v73_v30 }
  0x25   :  { %78 = vst [vmem:[#allocation2 + $0x3] sm:$0x1] %v77_v33 }
  0x2c   :  { %v82_v34 = vld [vmem:[#allocation2] sm:$0xf] }
  0x2d   :  { %v84_v35 = vsel %vm83_vm1, %v82_v34, 0.0 }
  0x2e   :  { %85 = vadd.xlane.f32.xlu0 %v84_v35 }
  0xbb   :  { %v86_v36 = vpop.xlane.xlu0 %85 }
  0xbc   :  { %88 = vst.msk [vmem:[%s153_s1] sm:$0xf] %vm87_vm2, %v86_v36 }
  0xbd   :  { %93 = vsyncpa [#allocation4], 1 }

</bundles_post_ra>
